<compile_context>
chip_gen: v5e
topology: v5e:2x2
jax: 0.10.0
libtpu: 0.0.40
codegen_flags: <defaults>
</compile_context>

<pallas_src>
import numpy as np
import jax
import jax.numpy as jnp
from jax.experimental import pallas as pl
from jax.experimental.pallas import tpu as pltpu

H3_PADDING_VALUE = 7
MAX_H3_RESOLUTION = 15
OUT_WIDTH = 4 + MAX_H3_RESOLUTION          # [mode, edge, resolution, base_cell] + 15 cells
_LANES = 128                               # batch fast axis -> vreg lanes
_ROW_ALIGN = 32                            # int8 native sublane tile
_MAX_ROW_TILE = 1024                       # 1024*128 = 131072 elems/step, ~7 MiB double-buffered
                                           # (fits v7x 64 MiB VMEM with big margin; grid stays
                                           #  multi-step on large batches for 2-TC sharding)


def _round_up(x, m):
    return (x + m - 1) // m * m


def _h3_kernel(hi_ref, lo_ref, out_ref):
    # hi/lo: (row_tile, 128) int32 = high/low 32-bit halves of the int64 H3 index,
    # batch element at (sublane r, lane l) is r*128 + l.
    # out:   (19, row_tile, 128) int8, field-major so every store is full-lane.
    hi = hi_ref[...]
    lo = lo_ref[...]

    res = (hi >> 20) & 15                               # 64-bit bits 52..55
    out_ref[0] = ((hi >> 27) & 15).astype(jnp.int8)     # mode, bits 59..62
    out_ref[1] = ((hi >> 24) & 7).astype(jnp.int8)      # edge, bits 56..58
    out_ref[2] = res.astype(jnp.int8)                   # resolution
    out_ref[3] = ((hi >> 13) & 127).astype(jnp.int8)    # base cell, bits 45..51

    # Cell digit i occupies 64-bit bits [s, s+2], s = 45 - 3*i.  All shift amounts
    # are static; the only data-dependent op left is the resolution padding select.
    for i in range(1, MAX_H3_RESOLUTION + 1):
        s = 45 - 3 * i
        if s >= 32:                                     # digit fully inside the high word
            dig = (hi >> (s - 32)) & 7
        elif s == 30:                                   # digit straddles the 32-bit boundary
            dig = ((lo >> 30) & 3) | ((hi & 1) << 2)
        else:                                           # digit fully inside the low word
            dig = (lo >> s) & 7
        out_ref[3 + i] = jnp.where(i <= res, dig, H3_PADDING_VALUE).astype(jnp.int8)


def h3_preprocessing(v, computed_fill_value):
    """Pallas equivalent of _H3Preprocessing.forward for a (batch,) tensor input."""
    # ---- host glue: nan_to_num + .long() + int64 -> 2x int32 split.
    # TODO(synk): the 64-bit handling stays in host numpy because default JAX
    # (x64 disabled) has no int64/float64; this mirrors torch .long() exactly.
    v_np = np.asarray(v)
    if np.issubdtype(v_np.dtype, np.floating):
        v_np = np.where(np.isnan(v_np),
                        np.asarray(computed_fill_value, dtype=v_np.dtype), v_np)
    v_i64 = v_np.astype(np.int64).reshape(-1)           # torch .long() truncation semantics
    u = v_i64.view(np.uint64)
    hi = (u >> np.uint64(32)).astype(np.uint32).view(np.int32)
    lo = (u & np.uint64(0xFFFFFFFF)).astype(np.uint32).view(np.int32)

    b = hi.shape[0]
    rows = -(-b // _LANES)
    row_tile = min(_MAX_ROW_TILE, _round_up(rows, _ROW_ALIGN))
    rows_p = _round_up(rows, row_tile)
    n_pad = rows_p * _LANES
    hi = np.pad(hi, (0, n_pad - b)).reshape(rows_p, _LANES)
    lo = np.pad(lo, (0, n_pad - b)).reshape(rows_p, _LANES)

    out8 = pl.pallas_call(
        _h3_kernel,
        out_shape=jax.ShapeDtypeStruct((OUT_WIDTH, rows_p, _LANES), jnp.int8),
        grid=(rows_p // row_tile,),
        in_specs=[pl.BlockSpec((row_tile, _LANES), lambda r: (r, 0)),
                  pl.BlockSpec((row_tile, _LANES), lambda r: (r, 0))],
        out_specs=pl.BlockSpec((OUT_WIDTH, row_tile, _LANES), lambda r: (0, r, 0)),
        compiler_params=pltpu.CompilerParams(dimension_semantics=("parallel",)),
    )(jnp.asarray(hi), jnp.asarray(lo))

    # (19, rows, 128) field-major -> (batch, 19); all fields are in 0..127 so the
    # int8 -> uint8 cast is value-preserving and fuses with this tiny XLA transpose.
    out = jnp.transpose(out8, (1, 2, 0)).reshape(n_pad, OUT_WIDTH)[:b]
    return out.astype(jnp.uint8)                        # matches torch.uint8 output


def _reference(v, computed_fill_value):
    """Pure numpy/python reference mirroring the PyTorch module."""
    v_np = np.asarray(v)
    if np.issubdtype(v_np.dtype, np.floating):
        v_np = np.where(np.isnan(v_np), computed_fill_value, v_np)
    v_i64 = v_np.astype(np.int64)
    rows = []
    for val in v_i64:
        u = int(val) & 0xFFFFFFFFFFFFFFFF
        mode = (u >> 59) & 15
        edge = (u >> 56) & 7
        res = (u >> 52) & 15
        base = (u >> 45) & 127
        cells = [(u >> (45 - 3 * i)) & 7 for i in range(1, res + 1)]
        cells += [H3_PADDING_VALUE] * (MAX_H3_RESOLUTION - len(cells))
        rows.append([mode, edge, res, base] + cells)
    return np.asarray(rows, dtype=np.uint8)


if __name__ == "__main__":
    # Deterministic synthetic H3 indices built from jax.random.PRNGKey(0).
    key = jax.random.PRNGKey(0)
    k_res, k_base, k_dig = jax.random.split(key, 3)
    batch = 300                                          # non-multiple of 128: exercises padding
    res = np.asarray(jax.random.randint(k_res, (batch,), 0, MAX_H3_RESOLUTION + 1))
    base = np.asarray(jax.random.randint(k_base, (batch,), 0, 122))
    digs = np.asarray(jax.random.randint(k_dig, (batch, MAX_H3_RESOLUTION), 0, 7))

    vals = []
    for bi in range(batch):
        u = (1 << 59) | (int(res[bi]) << 52) | (int(base[bi]) << 45)
        for i in range(1, MAX_H3_RESOLUTION + 1):
            d = int(digs[bi, i - 1]) if i <= int(res[bi]) else 7
            u |= d << (45 - 3 * i)
        vals.append(u)
    vals_i64 = np.array(vals, dtype=np.uint64).astype(np.int64)

    computed_fill_value = float(vals_i64[-1])            # metadata['preprocessing']['computed_fill_value']
    x = vals_i64.astype(np.float64)                      # module receives a float tensor
    x[0] = np.nan                                        # exercise the nan_to_num path

    out = h3_preprocessing(x, computed_fill_value)
    out = jax.block_until_ready(out)

    expected = _reference(x, computed_fill_value)
    assert out.shape == (batch, OUT_WIDTH), out.shape
    assert out.dtype == jnp.uint8, out.dtype
    np.testing.assert_array_equal(np.asarray(out), expected)
    print("KERNEL_OK")
</pallas_src>

<mosaic_0001>
module attributes {stable_mosaic.version = 11 : i64} {
  func.func @_h3_kernel(%arg0: i32, %arg1: memref<32x128xi32, #tpu.memory_space<vmem>>, %arg2: memref<32x128xi32, #tpu.memory_space<vmem>>, %arg3: memref<19x32x128xi8, #tpu.memory_space<vmem>>) attributes {dimension_semantics = [#tpu.dimension_semantics<parallel>], iteration_bounds = array<i64: 1>, scalar_prefetch = 0 : i64, scratch_operands = 0 : i64, tpu.core_type = #tpu.core_type<tc>, window_params = [{transform_indices = @transform_0, window_bounds = array<i64: 32, 128>}, {transform_indices = @transform_1, window_bounds = array<i64: 32, 128>}, {transform_indices = @transform_2, window_bounds = array<i64: 19, 32, 128>}]} {
    %c0 = arith.constant 0 : index
    %c0_0 = arith.constant 0 : index
    %0 = vector.load %arg1[%c0, %c0_0] : memref<32x128xi32, #tpu.memory_space<vmem>>, vector<32x128xi32>
    %c0_1 = arith.constant 0 : index
    %c0_2 = arith.constant 0 : index
    %1 = vector.load %arg2[%c0_1, %c0_2] : memref<32x128xi32, #tpu.memory_space<vmem>>, vector<32x128xi32>
    %c20_i32 = arith.constant 20 : i32
    %2 = vector.broadcast %c20_i32 : i32 to vector<32x128xi32>
    %3 = arith.shrsi %0, %2 : vector<32x128xi32>
    %c15_i32 = arith.constant 15 : i32
    %4 = vector.broadcast %c15_i32 : i32 to vector<32x128xi32>
    %5 = arith.andi %3, %4 : vector<32x128xi32>
    %c27_i32 = arith.constant 27 : i32
    %6 = vector.broadcast %c27_i32 : i32 to vector<32x128xi32>
    %7 = arith.shrsi %0, %6 : vector<32x128xi32>
    %c15_i32_3 = arith.constant 15 : i32
    %8 = vector.broadcast %c15_i32_3 : i32 to vector<32x128xi32>
    %9 = arith.andi %7, %8 : vector<32x128xi32>
    %10 = arith.trunci %9 : vector<32x128xi32> to vector<32x128xi8>
    %c0_4 = arith.constant 0 : index
    %c0_5 = arith.constant 0 : index
    %c0_6 = arith.constant 0 : index
    %11 = vector.load %arg3[%c0_4, %c0_5, %c0_6] : memref<19x32x128xi8, #tpu.memory_space<vmem>>, vector<1x32x128xi8>
    %12 = vector.shape_cast %11 : vector<1x32x128xi8> to vector<32x128xi8>
    %13 = vector.shape_cast %10 : vector<32x128xi8> to vector<1x32x128xi8>
    tpu.vector_store %arg3[%c0_4, %c0_5, %c0_6], %13 {strides = array<i32>} : memref<19x32x128xi8, #tpu.memory_space<vmem>>, vector<1x32x128xi8>,
    %c24_i32 = arith.constant 24 : i32
    %14 = vector.broadcast %c24_i32 : i32 to vector<32x128xi32>
    %15 = arith.shrsi %0, %14 : vector<32x128xi32>
    %c7_i32 = arith.constant 7 : i32
    %16 = vector.broadcast %c7_i32 : i32 to vector<32x128xi32>
    %17 = arith.andi %15, %16 : vector<32x128xi32>
    %18 = arith.trunci %17 : vector<32x128xi32> to vector<32x128xi8>
    %c1 = arith.constant 1 : index
    %c0_7 = arith.constant 0 : index
    %c0_8 = arith.constant 0 : index
    %19 = vector.load %arg3[%c1, %c0_7, %c0_8] : memref<19x32x128xi8, #tpu.memory_space<vmem>>, vector<1x32x128xi8>
    %20 = vector.shape_cast %19 : vector<1x32x128xi8> to vector<32x128xi8>
    %21 = vector.shape_cast %18 : vector<32x128xi8> to vector<1x32x128xi8>
    tpu.vector_store %arg3[%c1, %c0_7, %c0_8], %21 {strides = array<i32>} : memref<19x32x128xi8, #tpu.memory_space<vmem>>, vector<1x32x128xi8>,
    %22 = arith.trunci %5 : vector<32x128xi32> to vector<32x128xi8>
    %c2 = arith.constant 2 : index
    %c0_9 = arith.constant 0 : index
    %c0_10 = arith.constant 0 : index
    %23 = vector.load %arg3[%c2, %c0_9, %c0_10] : memref<19x32x128xi8, #tpu.memory_space<vmem>>, vector<1x32x128xi8>
    %24 = vector.shape_cast %23 : vector<1x32x128xi8> to vector<32x128xi8>
    %25 = vector.shape_cast %22 : vector<32x128xi8> to vector<1x32x128xi8>
    tpu.vector_store %arg3[%c2, %c0_9, %c0_10], %25 {strides = array<i32>} : memref<19x32x128xi8, #tpu.memory_space<vmem>>, vector<1x32x128xi8>,
    %c13_i32 = arith.constant 13 : i32
    %26 = vector.broadcast %c13_i32 : i32 to vector<32x128xi32>
    %27 = arith.shrsi %0, %26 : vector<32x128xi32>
    %c127_i32 = arith.constant 127 : i32
    %28 = vector.broadcast %c127_i32 : i32 to vector<32x128xi32>
    %29 = arith.andi %27, %28 : vector<32x128xi32>
    %30 = arith.trunci %29 : vector<32x128xi32> to vector<32x128xi8>
    %c3 = arith.constant 3 : index
    %c0_11 = arith.constant 0 : index
    %c0_12 = arith.constant 0 : index
    %31 = vector.load %arg3[%c3, %c0_11, %c0_12] : memref<19x32x128xi8, #tpu.memory_space<vmem>>, vector<1x32x128xi8>
    %32 = vector.shape_cast %31 : vector<1x32x128xi8> to vector<32x128xi8>
    %33 = vector.shape_cast %30 : vector<32x128xi8> to vector<1x32x128xi8>
    tpu.vector_store %arg3[%c3, %c0_11, %c0_12], %33 {strides = array<i32>} : memref<19x32x128xi8, #tpu.memory_space<vmem>>, vector<1x32x128xi8>,
    %c10_i32 = arith.constant 10 : i32
    %34 = vector.broadcast %c10_i32 : i32 to vector<32x128xi32>
    %35 = arith.shrsi %0, %34 : vector<32x128xi32>
    %c7_i32_13 = arith.constant 7 : i32
    %36 = vector.broadcast %c7_i32_13 : i32 to vector<32x128xi32>
    %37 = arith.andi %35, %36 : vector<32x128xi32>
    %c1_i32 = arith.constant 1 : i32
    %38 = vector.broadcast %c1_i32 : i32 to vector<32x128xi32>
    %39 = arith.cmpi sge, %5, %38 : vector<32x128xi32>
    %c7_i32_14 = arith.constant 7 : i32
    %40 = vector.broadcast %c7_i32_14 : i32 to vector<32x128xi32>
    %41 = arith.select %39, %37, %40 : vector<32x128xi1>, vector<32x128xi32>
    %42 = arith.trunci %41 : vector<32x128xi32> to vector<32x128xi8>
    %c4 = arith.constant 4 : index
    %c0_15 = arith.constant 0 : index
    %c0_16 = arith.constant 0 : index
    %43 = vector.load %arg3[%c4, %c0_15, %c0_16] : memref<19x32x128xi8, #tpu.memory_space<vmem>>, vector<1x32x128xi8>
    %44 = vector.shape_cast %43 : vector<1x32x128xi8> to vector<32x128xi8>
    %45 = vector.shape_cast %42 : vector<32x128xi8> to vector<1x32x128xi8>
    tpu.vector_store %arg3[%c4, %c0_15, %c0_16], %45 {strides = array<i32>} : memref<19x32x128xi8, #tpu.memory_space<vmem>>, vector<1x32x128xi8>,
    %c7_i32_17 = arith.constant 7 : i32
    %46 = vector.broadcast %c7_i32_17 : i32 to vector<32x128xi32>
    %47 = arith.shrsi %0, %46 : vector<32x128xi32>
    %c7_i32_18 = arith.constant 7 : i32
    %48 = vector.broadcast %c7_i32_18 : i32 to vector<32x128xi32>
    %49 = arith.andi %47, %48 : vector<32x128xi32>
    %c2_i32 = arith.constant 2 : i32
    %50 = vector.broadcast %c2_i32 : i32 to vector<32x128xi32>
    %51 = arith.cmpi sge, %5, %50 : vector<32x128xi32>
    %c7_i32_19 = arith.constant 7 : i32
    %52 = vector.broadcast %c7_i32_19 : i32 to vector<32x128xi32>
    %53 = arith.select %51, %49, %52 : vector<32x128xi1>, vector<32x128xi32>
    %54 = arith.trunci %53 : vector<32x128xi32> to vector<32x128xi8>
    %c5 = arith.constant 5 : index
    %c0_20 = arith.constant 0 : index
    %c0_21 = arith.constant 0 : index
    %55 = vector.load %arg3[%c5, %c0_20, %c0_21] : memref<19x32x128xi8, #tpu.memory_space<vmem>>, vector<1x32x128xi8>
    %56 = vector.shape_cast %55 : vector<1x32x128xi8> to vector<32x128xi8>
    %57 = vector.shape_cast %54 : vector<32x128xi8> to vector<1x32x128xi8>
    tpu.vector_store %arg3[%c5, %c0_20, %c0_21], %57 {strides = array<i32>} : memref<19x32x128xi8, #tpu.memory_space<vmem>>, vector<1x32x128xi8>,
    %c4_i32 = arith.constant 4 : i32
    %58 = vector.broadcast %c4_i32 : i32 to vector<32x128xi32>
    %59 = arith.shrsi %0, %58 : vector<32x128xi32>
    %c7_i32_22 = arith.constant 7 : i32
    %60 = vector.broadcast %c7_i32_22 : i32 to vector<32x128xi32>
    %61 = arith.andi %59, %60 : vector<32x128xi32>
    %c3_i32 = arith.constant 3 : i32
    %62 = vector.broadcast %c3_i32 : i32 to vector<32x128xi32>
    %63 = arith.cmpi sge, %5, %62 : vector<32x128xi32>
    %c7_i32_23 = arith.constant 7 : i32
    %64 = vector.broadcast %c7_i32_23 : i32 to vector<32x128xi32>
    %65 = arith.select %63, %61, %64 : vector<32x128xi1>, vector<32x128xi32>
    %66 = arith.trunci %65 : vector<32x128xi32> to vector<32x128xi8>
    %c6 = arith.constant 6 : index
    %c0_24 = arith.constant 0 : index
    %c0_25 = arith.constant 0 : index
    %67 = vector.load %arg3[%c6, %c0_24, %c0_25] : memref<19x32x128xi8, #tpu.memory_space<vmem>>, vector<1x32x128xi8>
    %68 = vector.shape_cast %67 : vector<1x32x128xi8> to vector<32x128xi8>
    %69 = vector.shape_cast %66 : vector<32x128xi8> to vector<1x32x128xi8>
    tpu.vector_store %arg3[%c6, %c0_24, %c0_25], %69 {strides = array<i32>} : memref<19x32x128xi8, #tpu.memory_space<vmem>>, vector<1x32x128xi8>,
    %c1_i32_26 = arith.constant 1 : i32
    %70 = vector.broadcast %c1_i32_26 : i32 to vector<32x128xi32>
    %71 = arith.shrsi %0, %70 : vector<32x128xi32>
    %c7_i32_27 = arith.constant 7 : i32
    %72 = vector.broadcast %c7_i32_27 : i32 to vector<32x128xi32>
    %73 = arith.andi %71, %72 : vector<32x128xi32>
    %c4_i32_28 = arith.constant 4 : i32
    %74 = vector.broadcast %c4_i32_28 : i32 to vector<32x128xi32>
    %75 = arith.cmpi sge, %5, %74 : vector<32x128xi32>
    %c7_i32_29 = arith.constant 7 : i32
    %76 = vector.broadcast %c7_i32_29 : i32 to vector<32x128xi32>
    %77 = arith.select %75, %73, %76 : vector<32x128xi1>, vector<32x128xi32>
    %78 = arith.trunci %77 : vector<32x128xi32> to vector<32x128xi8>
    %c7 = arith.constant 7 : index
    %c0_30 = arith.constant 0 : index
    %c0_31 = arith.constant 0 : index
    %79 = vector.load %arg3[%c7, %c0_30, %c0_31] : memref<19x32x128xi8, #tpu.memory_space<vmem>>, vector<1x32x128xi8>
    %80 = vector.shape_cast %79 : vector<1x32x128xi8> to vector<32x128xi8>
    %81 = vector.shape_cast %78 : vector<32x128xi8> to vector<1x32x128xi8>
    tpu.vector_store %arg3[%c7, %c0_30, %c0_31], %81 {strides = array<i32>} : memref<19x32x128xi8, #tpu.memory_space<vmem>>, vector<1x32x128xi8>,
    %c30_i32 = arith.constant 30 : i32
    %82 = vector.broadcast %c30_i32 : i32 to vector<32x128xi32>
    %83 = arith.shrsi %1, %82 : vector<32x128xi32>
    %c3_i32_32 = arith.constant 3 : i32
    %84 = vector.broadcast %c3_i32_32 : i32 to vector<32x128xi32>
    %85 = arith.andi %83, %84 : vector<32x128xi32>
    %c1_i32_33 = arith.constant 1 : i32
    %86 = vector.broadcast %c1_i32_33 : i32 to vector<32x128xi32>
    %87 = arith.andi %0, %86 : vector<32x128xi32>
    %c2_i32_34 = arith.constant 2 : i32
    %88 = vector.broadcast %c2_i32_34 : i32 to vector<32x128xi32>
    %89 = arith.shli %87, %88 : vector<32x128xi32>
    %90 = arith.ori %85, %89 : vector<32x128xi32>
    %c5_i32 = arith.constant 5 : i32
    %91 = vector.broadcast %c5_i32 : i32 to vector<32x128xi32>
    %92 = arith.cmpi sge, %5, %91 : vector<32x128xi32>
    %c7_i32_35 = arith.constant 7 : i32
    %93 = vector.broadcast %c7_i32_35 : i32 to vector<32x128xi32>
    %94 = arith.select %92, %90, %93 : vector<32x128xi1>, vector<32x128xi32>
    %95 = arith.trunci %94 : vector<32x128xi32> to vector<32x128xi8>
    %c8 = arith.constant 8 : index
    %c0_36 = arith.constant 0 : index
    %c0_37 = arith.constant 0 : index
    %96 = vector.load %arg3[%c8, %c0_36, %c0_37] : memref<19x32x128xi8, #tpu.memory_space<vmem>>, vector<1x32x128xi8>
    %97 = vector.shape_cast %96 : vector<1x32x128xi8> to vector<32x128xi8>
    %98 = vector.shape_cast %95 : vector<32x128xi8> to vector<1x32x128xi8>
    tpu.vector_store %arg3[%c8, %c0_36, %c0_37], %98 {strides = array<i32>} : memref<19x32x128xi8, #tpu.memory_space<vmem>>, vector<1x32x128xi8>,
    %c27_i32_38 = arith.constant 27 : i32
    %99 = vector.broadcast %c27_i32_38 : i32 to vector<32x128xi32>
    %100 = arith.shrsi %1, %99 : vector<32x128xi32>
    %c7_i32_39 = arith.constant 7 : i32
    %101 = vector.broadcast %c7_i32_39 : i32 to vector<32x128xi32>
    %102 = arith.andi %100, %101 : vector<32x128xi32>
    %c6_i32 = arith.constant 6 : i32
    %103 = vector.broadcast %c6_i32 : i32 to vector<32x128xi32>
    %104 = arith.cmpi sge, %5, %103 : vector<32x128xi32>
    %c7_i32_40 = arith.constant 7 : i32
    %105 = vector.broadcast %c7_i32_40 : i32 to vector<32x128xi32>
    %106 = arith.select %104, %102, %105 : vector<32x128xi1>, vector<32x128xi32>
    %107 = arith.trunci %106 : vector<32x128xi32> to vector<32x128xi8>
    %c9 = arith.constant 9 : index
    %c0_41 = arith.constant 0 : index
    %c0_42 = arith.constant 0 : index
    %108 = vector.load %arg3[%c9, %c0_41, %c0_42] : memref<19x32x128xi8, #tpu.memory_space<vmem>>, vector<1x32x128xi8>
    %109 = vector.shape_cast %108 : vector<1x32x128xi8> to vector<32x128xi8>
    %110 = vector.shape_cast %107 : vector<32x128xi8> to vector<1x32x128xi8>
    tpu.vector_store %arg3[%c9, %c0_41, %c0_42], %110 {strides = array<i32>} : memref<19x32x128xi8, #tpu.memory_space<vmem>>, vector<1x32x128xi8>,
    %c24_i32_43 = arith.constant 24 : i32
    %111 = vector.broadcast %c24_i32_43 : i32 to vector<32x128xi32>
    %112 = arith.shrsi %1, %111 : vector<32x128xi32>
    %c7_i32_44 = arith.constant 7 : i32
    %113 = vector.broadcast %c7_i32_44 : i32 to vector<32x128xi32>
    %114 = arith.andi %112, %113 : vector<32x128xi32>
    %c7_i32_45 = arith.constant 7 : i32
    %115 = vector.broadcast %c7_i32_45 : i32 to vector<32x128xi32>
    %116 = arith.cmpi sge, %5, %115 : vector<32x128xi32>
    %c7_i32_46 = arith.constant 7 : i32
    %117 = vector.broadcast %c7_i32_46 : i32 to vector<32x128xi32>
    %118 = arith.select %116, %114, %117 : vector<32x128xi1>, vector<32x128xi32>
    %119 = arith.trunci %118 : vector<32x128xi32> to vector<32x128xi8>
    %c10 = arith.constant 10 : index
    %c0_47 = arith.constant 0 : index
    %c0_48 = arith.constant 0 : index
    %120 = vector.load %arg3[%c10, %c0_47, %c0_48] : memref<19x32x128xi8, #tpu.memory_space<vmem>>, vector<1x32x128xi8>
    %121 = vector.shape_cast %120 : vector<1x32x128xi8> to vector<32x128xi8>
    %122 = vector.shape_cast %119 : vector<32x128xi8> to vector<1x32x128xi8>
    tpu.vector_store %arg3[%c10, %c0_47, %c0_48], %122 {strides = array<i32>} : memref<19x32x128xi8, #tpu.memory_space<vmem>>, vector<1x32x128xi8>,
    %c21_i32 = arith.constant 21 : i32
    %123 = vector.broadcast %c21_i32 : i32 to vector<32x128xi32>
    %124 = arith.shrsi %1, %123 : vector<32x128xi32>
    %c7_i32_49 = arith.constant 7 : i32
    %125 = vector.broadcast %c7_i32_49 : i32 to vector<32x128xi32>
    %126 = arith.andi %124, %125 : vector<32x128xi32>
    %c8_i32 = arith.constant 8 : i32
    %127 = vector.broadcast %c8_i32 : i32 to vector<32x128xi32>
    %128 = arith.cmpi sge, %5, %127 : vector<32x128xi32>
    %c7_i32_50 = arith.constant 7 : i32
    %129 = vector.broadcast %c7_i32_50 : i32 to vector<32x128xi32>
    %130 = arith.select %128, %126, %129 : vector<32x128xi1>, vector<32x128xi32>
    %131 = arith.trunci %130 : vector<32x128xi32> to vector<32x128xi8>
    %c11 = arith.constant 11 : index
    %c0_51 = arith.constant 0 : index
    %c0_52 = arith.constant 0 : index
    %132 = vector.load %arg3[%c11, %c0_51, %c0_52] : memref<19x32x128xi8, #tpu.memory_space<vmem>>, vector<1x32x128xi8>
    %133 = vector.shape_cast %132 : vector<1x32x128xi8> to vector<32x128xi8>
    %134 = vector.shape_cast %131 : vector<32x128xi8> to vector<1x32x128xi8>
    tpu.vector_store %arg3[%c11, %c0_51, %c0_52], %134 {strides = array<i32>} : memref<19x32x128xi8, #tpu.memory_space<vmem>>, vector<1x32x128xi8>,
    %c18_i32 = arith.constant 18 : i32
    %135 = vector.broadcast %c18_i32 : i32 to vector<32x128xi32>
    %136 = arith.shrsi %1, %135 : vector<32x128xi32>
    %c7_i32_53 = arith.constant 7 : i32
    %137 = vector.broadcast %c7_i32_53 : i32 to vector<32x128xi32>
    %138 = arith.andi %136, %137 : vector<32x128xi32>
    %c9_i32 = arith.constant 9 : i32
    %139 = vector.broadcast %c9_i32 : i32 to vector<32x128xi32>
    %140 = arith.cmpi sge, %5, %139 : vector<32x128xi32>
    %c7_i32_54 = arith.constant 7 : i32
    %141 = vector.broadcast %c7_i32_54 : i32 to vector<32x128xi32>
    %142 = arith.select %140, %138, %141 : vector<32x128xi1>, vector<32x128xi32>
    %143 = arith.trunci %142 : vector<32x128xi32> to vector<32x128xi8>
    %c12 = arith.constant 12 : index
    %c0_55 = arith.constant 0 : index
    %c0_56 = arith.constant 0 : index
    %144 = vector.load %arg3[%c12, %c0_55, %c0_56] : memref<19x32x128xi8, #tpu.memory_space<vmem>>, vector<1x32x128xi8>
    %145 = vector.shape_cast %144 : vector<1x32x128xi8> to vector<32x128xi8>
    %146 = vector.shape_cast %143 : vector<32x128xi8> to vector<1x32x128xi8>
    tpu.vector_store %arg3[%c12, %c0_55, %c0_56], %146 {strides = array<i32>} : memref<19x32x128xi8, #tpu.memory_space<vmem>>, vector<1x32x128xi8>,
    %c15_i32_57 = arith.constant 15 : i32
    %147 = vector.broadcast %c15_i32_57 : i32 to vector<32x128xi32>
    %148 = arith.shrsi %1, %147 : vector<32x128xi32>
    %c7_i32_58 = arith.constant 7 : i32
    %149 = vector.broadcast %c7_i32_58 : i32 to vector<32x128xi32>
    %150 = arith.andi %148, %149 : vector<32x128xi32>
    %c10_i32_59 = arith.constant 10 : i32
    %151 = vector.broadcast %c10_i32_59 : i32 to vector<32x128xi32>
    %152 = arith.cmpi sge, %5, %151 : vector<32x128xi32>
    %c7_i32_60 = arith.constant 7 : i32
    %153 = vector.broadcast %c7_i32_60 : i32 to vector<32x128xi32>
    %154 = arith.select %152, %150, %153 : vector<32x128xi1>, vector<32x128xi32>
    %155 = arith.trunci %154 : vector<32x128xi32> to vector<32x128xi8>
    %c13 = arith.constant 13 : index
    %c0_61 = arith.constant 0 : index
    %c0_62 = arith.constant 0 : index
    %156 = vector.load %arg3[%c13, %c0_61, %c0_62] : memref<19x32x128xi8, #tpu.memory_space<vmem>>, vector<1x32x128xi8>
    %157 = vector.shape_cast %156 : vector<1x32x128xi8> to vector<32x128xi8>
    %158 = vector.shape_cast %155 : vector<32x128xi8> to vector<1x32x128xi8>
    tpu.vector_store %arg3[%c13, %c0_61, %c0_62], %158 {strides = array<i32>} : memref<19x32x128xi8, #tpu.memory_space<vmem>>, vector<1x32x128xi8>,
    %c12_i32 = arith.constant 12 : i32
    %159 = vector.broadcast %c12_i32 : i32 to vector<32x128xi32>
    %160 = arith.shrsi %1, %159 : vector<32x128xi32>
    %c7_i32_63 = arith.constant 7 : i32
    %161 = vector.broadcast %c7_i32_63 : i32 to vector<32x128xi32>
    %162 = arith.andi %160, %161 : vector<32x128xi32>
    %c11_i32 = arith.constant 11 : i32
    %163 = vector.broadcast %c11_i32 : i32 to vector<32x128xi32>
    %164 = arith.cmpi sge, %5, %163 : vector<32x128xi32>
    %c7_i32_64 = arith.constant 7 : i32
    %165 = vector.broadcast %c7_i32_64 : i32 to vector<32x128xi32>
    %166 = arith.select %164, %162, %165 : vector<32x128xi1>, vector<32x128xi32>
    %167 = arith.trunci %166 : vector<32x128xi32> to vector<32x128xi8>
    %c14 = arith.constant 14 : index
    %c0_65 = arith.constant 0 : index
    %c0_66 = arith.constant 0 : index
    %168 = vector.load %arg3[%c14, %c0_65, %c0_66] : memref<19x32x128xi8, #tpu.memory_space<vmem>>, vector<1x32x128xi8>
    %169 = vector.shape_cast %168 : vector<1x32x128xi8> to vector<32x128xi8>
    %170 = vector.shape_cast %167 : vector<32x128xi8> to vector<1x32x128xi8>
    tpu.vector_store %arg3[%c14, %c0_65, %c0_66], %170 {strides = array<i32>} : memref<19x32x128xi8, #tpu.memory_space<vmem>>, vector<1x32x128xi8>,
    %c9_i32_67 = arith.constant 9 : i32
    %171 = vector.broadcast %c9_i32_67 : i32 to vector<32x128xi32>
    %172 = arith.shrsi %1, %171 : vector<32x128xi32>
    %c7_i32_68 = arith.constant 7 : i32
    %173 = vector.broadcast %c7_i32_68 : i32 to vector<32x128xi32>
    %174 = arith.andi %172, %173 : vector<32x128xi32>
    %c12_i32_69 = arith.constant 12 : i32
    %175 = vector.broadcast %c12_i32_69 : i32 to vector<32x128xi32>
    %176 = arith.cmpi sge, %5, %175 : vector<32x128xi32>
    %c7_i32_70 = arith.constant 7 : i32
    %177 = vector.broadcast %c7_i32_70 : i32 to vector<32x128xi32>
    %178 = arith.select %176, %174, %177 : vector<32x128xi1>, vector<32x128xi32>
    %179 = arith.trunci %178 : vector<32x128xi32> to vector<32x128xi8>
    %c15 = arith.constant 15 : index
    %c0_71 = arith.constant 0 : index
    %c0_72 = arith.constant 0 : index
    %180 = vector.load %arg3[%c15, %c0_71, %c0_72] : memref<19x32x128xi8, #tpu.memory_space<vmem>>, vector<1x32x128xi8>
    %181 = vector.shape_cast %180 : vector<1x32x128xi8> to vector<32x128xi8>
    %182 = vector.shape_cast %179 : vector<32x128xi8> to vector<1x32x128xi8>
    tpu.vector_store %arg3[%c15, %c0_71, %c0_72], %182 {strides = array<i32>} : memref<19x32x128xi8, #tpu.memory_space<vmem>>, vector<1x32x128xi8>,
    %c6_i32_73 = arith.constant 6 : i32
    %183 = vector.broadcast %c6_i32_73 : i32 to vector<32x128xi32>
    %184 = arith.shrsi %1, %183 : vector<32x128xi32>
    %c7_i32_74 = arith.constant 7 : i32
    %185 = vector.broadcast %c7_i32_74 : i32 to vector<32x128xi32>
    %186 = arith.andi %184, %185 : vector<32x128xi32>
    %c13_i32_75 = arith.constant 13 : i32
    %187 = vector.broadcast %c13_i32_75 : i32 to vector<32x128xi32>
    %188 = arith.cmpi sge, %5, %187 : vector<32x128xi32>
    %c7_i32_76 = arith.constant 7 : i32
    %189 = vector.broadcast %c7_i32_76 : i32 to vector<32x128xi32>
    %190 = arith.select %188, %186, %189 : vector<32x128xi1>, vector<32x128xi32>
    %191 = arith.trunci %190 : vector<32x128xi32> to vector<32x128xi8>
    %c16 = arith.constant 16 : index
    %c0_77 = arith.constant 0 : index
    %c0_78 = arith.constant 0 : index
    %192 = vector.load %arg3[%c16, %c0_77, %c0_78] : memref<19x32x128xi8, #tpu.memory_space<vmem>>, vector<1x32x128xi8>
    %193 = vector.shape_cast %192 : vector<1x32x128xi8> to vector<32x128xi8>
    %194 = vector.shape_cast %191 : vector<32x128xi8> to vector<1x32x128xi8>
    tpu.vector_store %arg3[%c16, %c0_77, %c0_78], %194 {strides = array<i32>} : memref<19x32x128xi8, #tpu.memory_space<vmem>>, vector<1x32x128xi8>,
    %c3_i32_79 = arith.constant 3 : i32
    %195 = vector.broadcast %c3_i32_79 : i32 to vector<32x128xi32>
    %196 = arith.shrsi %1, %195 : vector<32x128xi32>
    %c7_i32_80 = arith.constant 7 : i32
    %197 = vector.broadcast %c7_i32_80 : i32 to vector<32x128xi32>
    %198 = arith.andi %196, %197 : vector<32x128xi32>
    %c14_i32 = arith.constant 14 : i32
    %199 = vector.broadcast %c14_i32 : i32 to vector<32x128xi32>
    %200 = arith.cmpi sge, %5, %199 : vector<32x128xi32>
    %c7_i32_81 = arith.constant 7 : i32
    %201 = vector.broadcast %c7_i32_81 : i32 to vector<32x128xi32>
    %202 = arith.select %200, %198, %201 : vector<32x128xi1>, vector<32x128xi32>
    %203 = arith.trunci %202 : vector<32x128xi32> to vector<32x128xi8>
    %c17 = arith.constant 17 : index
    %c0_82 = arith.constant 0 : index
    %c0_83 = arith.constant 0 : index
    %204 = vector.load %arg3[%c17, %c0_82, %c0_83] : memref<19x32x128xi8, #tpu.memory_space<vmem>>, vector<1x32x128xi8>
    %205 = vector.shape_cast %204 : vector<1x32x128xi8> to vector<32x128xi8>
    %206 = vector.shape_cast %203 : vector<32x128xi8> to vector<1x32x128xi8>
    tpu.vector_store %arg3[%c17, %c0_82, %c0_83], %206 {strides = array<i32>} : memref<19x32x128xi8, #tpu.memory_space<vmem>>, vector<1x32x128xi8>,
    %c0_i32 = arith.constant 0 : i32
    %207 = vector.broadcast %c0_i32 : i32 to vector<32x128xi32>
    %208 = arith.shrsi %1, %207 : vector<32x128xi32>
    %c7_i32_84 = arith.constant 7 : i32
    %209 = vector.broadcast %c7_i32_84 : i32 to vector<32x128xi32>
    %210 = arith.andi %208, %209 : vector<32x128xi32>
    %c15_i32_85 = arith.constant 15 : i32
    %211 = vector.broadcast %c15_i32_85 : i32 to vector<32x128xi32>
    %212 = arith.cmpi sge, %5, %211 : vector<32x128xi32>
    %c7_i32_86 = arith.constant 7 : i32
    %213 = vector.broadcast %c7_i32_86 : i32 to vector<32x128xi32>
    %214 = arith.select %212, %210, %213 : vector<32x128xi1>, vector<32x128xi32>
    %215 = arith.trunci %214 : vector<32x128xi32> to vector<32x128xi8>
    %c18 = arith.constant 18 : index
    %c0_87 = arith.constant 0 : index
    %c0_88 = arith.constant 0 : index
    %216 = vector.load %arg3[%c18, %c0_87, %c0_88] : memref<19x32x128xi8, #tpu.memory_space<vmem>>, vector<1x32x128xi8>
    %217 = vector.shape_cast %216 : vector<1x32x128xi8> to vector<32x128xi8>
    %218 = vector.shape_cast %215 : vector<32x128xi8> to vector<1x32x128xi8>
    tpu.vector_store %arg3[%c18, %c0_87, %c0_88], %218 {strides = array<i32>} : memref<19x32x128xi8, #tpu.memory_space<vmem>>, vector<1x32x128xi8>,
    return
  }
  func.func @transform_0(%arg0: i32) -> (i32, i32) {
    %c0_i32 = arith.constant 0 : i32
    %c0_i32_0 = arith.constant 0 : i32
    return %arg0, %c0_i32 : i32, i32
  }
  func.func @transform_1(%arg0: i32) -> (i32, i32) {
    %c0_i32 = arith.constant 0 : i32
    %c0_i32_0 = arith.constant 0 : i32
    return %arg0, %c0_i32 : i32, i32
  }
  func.func @transform_2(%arg0: i32) -> (i32, i32, i32) {
    %c0_i32 = arith.constant 0 : i32
    %c0_i32_0 = arith.constant 0 : i32
    %c0_i32_1 = arith.constant 0 : i32
    return %c0_i32, %arg0, %c0_i32_0 : i32, i32, i32
  }
}

</mosaic_0001>

<bundles_post_ra>
// kernel: tpu_custom_call.1
= control target key start
LH: loop header
LB: loop body
LE: loop exit
PB: predicated region body
PF: predicated region fallthrough
CT: control target
= control target key end

     0   :  { %7 = vsyncpa [#allocation3], 0  ;;  %s747_s0 = inlined_call_operand.hbm [shape: s32[32,128], index: 0, kind: input, shape index: {}]   ;;  %s748_s1 = inlined_call_operand.hbm [shape: s32[32,128], index: 1, kind: input, shape index: {}]   ;;  %s749_s2 = inlined_call_operand.hbm [shape: s8[19,32,128], index: 2, kind: output, shape index: {}]  }
   0x1   :  { %8 = vsyncpa [#allocation6], 0 }
   0x2   :  { %9 = vsyncpa [#allocation4], 0  ;;  %s14_s11 = sshll.u32 %s747_s0, 4  ;;  %s533_s12 = smov [#allocation2]   ;;  %s15_s11 = int_to_ptr.hbm [resolvable:$true] %s14_s11 }
   0x3   :  { %s16_s13 = sshll.u32 %s533_s12, 4  ;;  %s27_s16 = sshll.u32 %s748_s1, 4  ;;  %s17_s13 = int_to_ptr.vmem [resolvable:$true] %s16_s13  ;;  %s28_s16 = int_to_ptr.hbm [resolvable:$true] %s27_s16 }
   0x4   :  { %s534_s17 = smov 128   ;;  %s535_s18 = smov 8  }
   0x5   :  { %22 = dma.hbm_to_vmem [thread:$0]  %s15_s11, 512, %s17_s13, [#allocation3], %s534_s17, %s534_s17, %s535_s18  }
   0x6   :  { %s536_s19 = smov [#allocation5]  }
   0x7   :  { %s29_s20 = sshll.u32 %s536_s19, 4  ;;  %s30_s20 = int_to_ptr.vmem [resolvable:$true] %s29_s20 }
   0x8   :  { %35 = dma.hbm_to_vmem [thread:$0]  %s28_s16, 512, %s30_s20, [#allocation6], %s534_s17, %s534_s17, %s535_s18  }
   0x9   :  { %527 = dma.done.wait [#allocation3], 512  }
   0xa   :  { %528 = vsyncadd [#allocation3], 4294966784 }
   0xb   :  { %529 = dma.done.wait [#allocation6], 512  }
   0xc   :  { %530 = vsyncadd [#allocation6], 4294966784  ;;  %v565_v0 = vld [vmem:[#allocation2] sm:$0xff]  ;;  %v567_v1 = vld [vmem:[#allocation2 + $0x8] sm:$0xff]  ;;  %s537_s0 = smov [#allocation7]   ;;  %s432_s23 = sshll.u32 %s749_s2, 4  ;;  %s433_s23 = int_to_ptr.hbm [resolvable:$true] %s432_s23 }
   0xd   :  { %v569_v2 = vld [vmem:[#allocation2 + $0x10] sm:$0xff]  ;;  %v571_v3 = vld [vmem:[#allocation2 + $0x18] sm:$0xff]  ;;  %v52_v4 = vshra.s32 %v565_v0, 20  ;;  %v53_v5 = vshra.s32 %v567_v1, 20  ;;  %v60_v7 = vshra.s32 %v565_v0, 27  ;;  %v61_v9 = vshra.s32 %v567_v1, 27 }
   0xe   :  { %v54_v6 = vshra.s32 %v569_v2, 20  ;;  %v55_v8 = vshra.s32 %v571_v3, 20  ;;  %v62_v10 = vshra.s32 %v569_v2, 27  ;;  %v63_v11 = vshra.s32 %v571_v3, 27  ;;  %s430_s1 = sshll.u32 %s537_s0, 4  ;;  %s431_s1 = int_to_ptr.vmem [resolvable:$true] %s430_s1 }
   0xf   :  { %v581_v12 = vand.u32 15, %v52_v4  ;;  %v583_v13 = vand.u32 15, %v53_v5  ;;  %v64_v15 = vand.u32 15, %v60_v7  ;;  %v65_v17 = vand.u32 15, %v61_v9 }
  0x10   :  { %v585_v14 = vand.u32 15, %v54_v6  ;;  %v587_v16 = vand.u32 15, %v55_v8  ;;  %v66_v18 = vand.u32 15, %v62_v10  ;;  %v67_v19 = vand.u32 15, %v63_v11 }
  0x11   :  { %v72_v20 = vshra.s32 %v565_v0, 24  ;;  %v73_v21 = vshra.s32 %v567_v1, 24  ;;  %v74_v22 = vshra.s32 %v569_v2, 24  ;;  %v75_v23 = vshra.s32 %v571_v3, 24 }
  0x12   :  { %v68_v24 = vpack.c.b16 %v65_v17, %v64_v15  ;;  %v69_v25 = vpack.c.b16 %v67_v19, %v66_v18  ;;  %v85_v26 = vpack.c.b16 %v583_v13, %v581_v12  ;;  %v86_v27 = vpack.c.b16 %v587_v16, %v585_v14 }
  0x13   :  { %v76_v28 = vand.u32 7, %v72_v20  ;;  %v77_v29 = vand.u32 7, %v73_v21  ;;  %v78_v30 = vand.u32 7, %v74_v22  ;;  %v79_v31 = vand.u32 7, %v75_v23 }
  0x14   :  { %v70_v32 = vpack.c.b8 %v69_v25, %v68_v24  ;;  %v87_v33 = vpack.c.b8 %v86_v27, %v85_v26  ;;  %v90_v34 = vshra.s32 %v565_v0, 13  ;;  %v91_v35 = vshra.s32 %v567_v1, 13 }
  0x15   :  { %v80_v36 = vpack.c.b16 %v77_v29, %v76_v28  ;;  %v81_v37 = vpack.c.b16 %v79_v31, %v78_v30  ;;  %v92_v38 = vshra.s32 %v569_v2, 13  ;;  %v93_v39 = vshra.s32 %v571_v3, 13 }
  0x16   :  { %71 = vst [vmem:[#allocation7] sm:$0xff] %v70_v32  ;;  %v94_v40 = vand.u32 127, %v90_v34  ;;  %v95_v41 = vand.u32 127, %v91_v35  ;;  %v103_v42 = vshra.s32 %v565_v0, 10  ;;  %v104_v43 = vshra.s32 %v567_v1, 10 }
  0x17   :  { %v82_v44 = vpack.c.b8 %v81_v37, %v80_v36  ;;  %89 = vst [vmem:[#allocation7 + $0x10] sm:$0xff] %v87_v33  ;;  %v96_v45 = vand.u32 127, %v92_v38  ;;  %v97_v46 = vand.u32 127, %v93_v39  ;;  %v105_v47 = vshra.s32 %v569_v2, 10 }
  0x18   :  { %v98_v48 = vpack.c.b16 %v95_v41, %v94_v40  ;;  %v106_v49 = vshra.s32 %v571_v3, 10  ;;  %v107_v50 = vand.u32 7, %v103_v42  ;;  %v108_v51 = vand.u32 7, %v104_v43  ;;  %v629_v40 = vld [vmem:[#allocation5] sm:$0xff]  ;;  %v631_v41 = vld [vmem:[#allocation5 + $0x8] sm:$0xff]  ;;  %v636_v43 = vld [vmem:[#allocation5 + $0x10] sm:$0xff] }
  0x19   :  { %84 = vst [vmem:[#allocation7 + $0x8] sm:$0xff] %v82_v44  ;;  %v99_v52 = vpack.c.b16 %v97_v46, %v96_v45  ;;  %v109_v53 = vand.u32 7, %v105_v47  ;;  %vm111_vm0 = vcmp.ge.s32.totalorder %v581_v12, 1  ;;  %vm112_vm1 = vcmp.ge.s32.totalorder %v583_v13, 1 }
  0x1a   :  { %v110_v54 = vand.u32 7, %v106_v49  ;;  %vm113_vm2 = vcmp.ge.s32.totalorder %v585_v14, 1  ;;  %vm114_vm3 = vcmp.ge.s32.totalorder %v587_v16, 1  ;;  %v115_v55 = vsel %vm111_vm0, %v107_v50, 7 }
  0x1b   :  { %v100_v56 = vpack.c.b8 %v99_v52, %v98_v48  ;;  %v116_v57 = vsel %vm112_vm1, %v108_v51, 7  ;;  %v117_v58 = vsel %vm113_vm2, %v109_v53, 7  ;;  %v124_v59 = vshra.s32 %v565_v0, 7  ;;  %v638_v48 = vld [vmem:[#allocation5 + $0x18] sm:$0xff] }
  0x1c   :  { %v118_v60 = vsel %vm114_vm3, %v110_v54, 7  ;;  %v119_v61 = vpack.c.b16 %v116_v57, %v115_v55  ;;  %v125_v62 = vshra.s32 %v567_v1, 7  ;;  %v126_v63 = vshra.s32 %v569_v2, 7 }
  0x1d   :  { %102 = vst [vmem:[#allocation7 + $0x18] sm:$0xff] %v100_v56  ;;  %v120_v4 = vpack.c.b16 %v118_v60, %v117_v58  ;;  %v127_v5 = vshra.s32 %v571_v3, 7  ;;  %v128_v6 = vand.u32 7, %v124_v59  ;;  %vm132_vm4 = vcmp.ge.s32.totalorder %v581_v12, 2 }
  0x1e   :  { %v129_v7 = vand.u32 7, %v125_v62  ;;  %v130_v8 = vand.u32 7, %v126_v63  ;;  %vm133_vm5 = vcmp.ge.s32.totalorder %v583_v13, 2  ;;  %vm134_vm6 = vcmp.ge.s32.totalorder %v585_v14, 2 }
  0x1f   :  { %v121_v9 = vpack.c.b8 %v120_v4, %v119_v61  ;;  %v131_v10 = vand.u32 7, %v127_v5  ;;  %vm135_vm7 = vcmp.ge.s32.totalorder %v587_v16, 2  ;;  %v136_v11 = vsel %vm132_vm4, %v128_v6, 7 }
  0x20   :  { %v137_v15 = vsel %vm133_vm5, %v129_v7, 7  ;;  %v138_v17 = vsel %vm134_vm6, %v130_v8, 7  ;;  %v145_v18 = vshra.s32 %v565_v0, 4  ;;  %v146_v19 = vshra.s32 %v567_v1, 4 }
  0x21   :  { %123 = vst [vmem:[#allocation7 + $0x20] sm:$0xff] %v121_v9  ;;  %v139_v20 = vsel %vm135_vm7, %v131_v10, 7  ;;  %v140_v21 = vpack.c.b16 %v137_v15, %v136_v11  ;;  %v147_v22 = vshra.s32 %v569_v2, 4  ;;  %v148_v23 = vshra.s32 %v571_v3, 4 }
  0x22   :  { %v141_v24 = vpack.c.b16 %v139_v20, %v138_v17  ;;  %v149_v25 = vand.u32 7, %v145_v18  ;;  %v150_v26 = vand.u32 7, %v146_v19  ;;  %vm153_vm8 = vcmp.ge.s32.totalorder %v581_v12, 3 }
  0x23   :  { %v151_v27 = vand.u32 7, %v147_v22  ;;  %v152_v28 = vand.u32 7, %v148_v23  ;;  %vm154_vm9 = vcmp.ge.s32.totalorder %v583_v13, 3  ;;  %vm155_vm10 = vcmp.ge.s32.totalorder %v585_v14, 3 }
  0x24   :  { %v142_v29 = vpack.c.b8 %v141_v24, %v140_v21  ;;  %vm156_vm11 = vcmp.ge.s32.totalorder %v587_v16, 3  ;;  %v157_v30 = vsel %vm153_vm8, %v149_v25, 7  ;;  %v158_v31 = vsel %vm154_vm9, %v150_v26, 7 }
  0x25   :  { %v159_v32 = vsel %vm155_vm10, %v151_v27, 7  ;;  %v160_v33 = vsel %vm156_vm11, %v152_v28, 7  ;;  %v161_v34 = vpack.c.b16 %v158_v31, %v157_v30  ;;  %v166_v35 = vshra.s32 %v565_v0, 1 }
  0x26   :  { %144 = vst [vmem:[#allocation7 + $0x28] sm:$0xff] %v142_v29  ;;  %v162_v36 = vpack.c.b16 %v160_v33, %v159_v32  ;;  %v167_v37 = vshra.s32 %v567_v1, 1  ;;  %v168_v38 = vshra.s32 %v569_v2, 1  ;;  %v169_v39 = vshra.s32 %v571_v3, 1 }
  0x27   :  { %v170_v42 = vand.u32 7, %v166_v35  ;;  %vm174_vm12 = vcmp.ge.s32.totalorder %v581_v12, 4  ;;  %vm175_vm13 = vcmp.ge.s32.totalorder %v583_v13, 4  ;;  %vm176_vm14 = vcmp.ge.s32.totalorder %v585_v14, 4 }
  0x28   :  { %v163_v44 = vpack.c.b8 %v162_v36, %v161_v34  ;;  %v171_v45 = vand.u32 7, %v167_v37  ;;  %v172_v46 = vand.u32 7, %v168_v38  ;;  %v173_v47 = vand.u32 7, %v169_v39 }
  0x29   :  { %vm177_vm15 = vcmp.ge.s32.totalorder %v587_v16, 4  ;;  %v178_v49 = vsel %vm174_vm12, %v170_v42, 7  ;;  %v446_v50 = vshrl.u32 %v629_v40, 30  ;;  %v447_v51 = vshrl.u32 %v631_v41, 30 }
  0x2a   :  { %165 = vst [vmem:[#allocation7 + $0x30] sm:$0xff] %v163_v44  ;;  %v179_v52 = vsel %vm175_vm13, %v171_v45, 7  ;;  %v180_v53 = vsel %vm176_vm14, %v172_v46, 7  ;;  %v181_v54 = vsel %vm177_vm15, %v173_v47, 7  ;;  %v448_v55 = vshrl.u32 %v636_v43, 30 }
  0x2b   :  { %v182_v56 = vpack.c.b16 %v179_v52, %v178_v49  ;;  %v183_v57 = vpack.c.b16 %v181_v54, %v180_v53  ;;  %v449_v58 = vshrl.u32 %v638_v48, 30  ;;  %v195_v59 = vand.u32 1, %v565_v0 }
  0x2c   :  { %v196_v60 = vand.u32 1, %v567_v1  ;;  %v197_v61 = vand.u32 1, %v569_v2  ;;  %v198_v62 = vand.u32 1, %v571_v3  ;;  %vm207_vm0 = vcmp.ge.s32.totalorder %v581_v12, 5 }
  0x2d   :  { %v184_v63 = vpack.c.b8 %v183_v57, %v182_v56  ;;  %v199_v4 = vshll.u32 %v195_v59, 2  ;;  %vm208_vm1 = vcmp.ge.s32.totalorder %v583_v13, 5  ;;  %vm209_vm2 = vcmp.ge.s32.totalorder %v585_v14, 5 }
  0x2e   :  { %v200_v5 = vshll.u32 %v196_v60, 2  ;;  %v201_v6 = vshll.u32 %v197_v61, 2  ;;  %v202_v7 = vshll.u32 %v198_v62, 2  ;;  %vm210_vm3 = vcmp.ge.s32.totalorder %v587_v16, 5 }
  0x2f   :  { %186 = vst [vmem:[#allocation7 + $0x38] sm:$0xff] %v184_v63  ;;  %v203_v0 = vor.u32 %v446_v50, %v199_v4  ;;  %v220_v1 = vshra.s32 %v629_v40, 27  ;;  %v221_v2 = vshra.s32 %v631_v41, 27  ;;  %v222_v3 = vshra.s32 %v636_v43, 27 }
  0x30   :  { %v204_v8 = vor.u32 %v447_v51, %v200_v5  ;;  %v205_v9 = vor.u32 %v448_v55, %v201_v6  ;;  %v206_v10 = vor.u32 %v449_v58, %v202_v7  ;;  %v223_v11 = vshra.s32 %v638_v48, 27 }
  0x31   :  { %v211_v15 = vsel %vm207_vm0, %v203_v0, 7  ;;  %v224_v17 = vand.u32 7, %v220_v1  ;;  %v225_v18 = vand.u32 7, %v221_v2  ;;  %v226_v19 = vand.u32 7, %v222_v3 }
  0x32   :  { %v212_v20 = vsel %vm208_vm1, %v204_v8, 7  ;;  %v213_v21 = vsel %vm209_vm2, %v205_v9, 7  ;;  %v214_v22 = vsel %vm210_vm3, %v206_v10, 7  ;;  %v227_v23 = vand.u32 7, %v223_v11 }
  0x33   :  { %v215_v24 = vpack.c.b16 %v212_v20, %v211_v15  ;;  %v216_v25 = vpack.c.b16 %v214_v22, %v213_v21  ;;  %vm228_vm4 = vcmp.ge.s32.totalorder %v581_v12, 6  ;;  %vm229_vm5 = vcmp.ge.s32.totalorder %v583_v13, 6 }
  0x34   :  { %vm230_vm6 = vcmp.ge.s32.totalorder %v585_v14, 6  ;;  %vm231_vm7 = vcmp.ge.s32.totalorder %v587_v16, 6  ;;  %v232_v26 = vsel %vm228_vm4, %v224_v17, 7  ;;  %v233_v27 = vsel %vm229_vm5, %v225_v18, 7 }
  0x35   :  { %v217_v28 = vpack.c.b8 %v216_v25, %v215_v24  ;;  %v234_v29 = vsel %vm230_vm6, %v226_v19, 7  ;;  %v235_v30 = vsel %vm231_vm7, %v227_v23, 7  ;;  %v236_v31 = vpack.c.b16 %v233_v27, %v232_v26 }
  0x36   :  { %v237_v32 = vpack.c.b16 %v235_v30, %v234_v29  ;;  %v241_v33 = vshra.s32 %v629_v40, 24  ;;  %v242_v34 = vshra.s32 %v631_v41, 24  ;;  %v243_v35 = vshra.s32 %v636_v43, 24 }
  0x37   :  { %219 = vst [vmem:[#allocation7 + $0x40] sm:$0xff] %v217_v28  ;;  %v244_v36 = vshra.s32 %v638_v48, 24  ;;  %vm249_vm8 = vcmp.ge.s32.totalorder %v581_v12, 7  ;;  %vm250_vm9 = vcmp.ge.s32.totalorder %v583_v13, 7  ;;  %vm251_vm10 = vcmp.ge.s32.totalorder %v585_v14, 7 }
  0x38   :  { %v238_v37 = vpack.c.b8 %v237_v32, %v236_v31  ;;  %v245_v38 = vand.u32 7, %v241_v33  ;;  %v246_v39 = vand.u32 7, %v242_v34  ;;  %v247_v42 = vand.u32 7, %v243_v35 }
  0x39   :  { %v248_v44 = vand.u32 7, %v244_v36  ;;  %vm252_vm11 = vcmp.ge.s32.totalorder %v587_v16, 7  ;;  %v262_v45 = vshra.s32 %v629_v40, 21  ;;  %v263_v46 = vshra.s32 %v631_v41, 21 }
  0x3a   :  { %240 = vst [vmem:[#allocation7 + $0x48] sm:$0xff] %v238_v37  ;;  %v253_v47 = vsel %vm249_vm8, %v245_v38, 7  ;;  %v254_v49 = vsel %vm250_vm9, %v246_v39, 7  ;;  %v255_v50 = vsel %vm251_vm10, %v247_v42, 7  ;;  %v264_v51 = vshra.s32 %v636_v43, 21 }
  0x3b   :  { %v256_v52 = vsel %vm252_vm11, %v248_v44, 7  ;;  %v257_v53 = vpack.c.b16 %v254_v49, %v253_v47  ;;  %v265_v54 = vshra.s32 %v638_v48, 21  ;;  %v266_v55 = vand.u32 7, %v262_v45 }
  0x3c   :  { %v258_v56 = vpack.c.b16 %v256_v52, %v255_v50  ;;  %v267_v57 = vand.u32 7, %v263_v46  ;;  %v268_v58 = vand.u32 7, %v264_v51  ;;  %vm270_vm12 = vcmp.ge.s32.totalorder %v581_v12, 8 }
  0x3d   :  { %v269_v59 = vand.u32 7, %v265_v54  ;;  %vm271_vm13 = vcmp.ge.s32.totalorder %v583_v13, 8  ;;  %vm272_vm14 = vcmp.ge.s32.totalorder %v585_v14, 8  ;;  %vm273_vm15 = vcmp.ge.s32.totalorder %v587_v16, 8 }
  0x3e   :  { %v259_v60 = vpack.c.b8 %v258_v56, %v257_v53  ;;  %v274_v61 = vsel %vm270_vm12, %v266_v55, 7  ;;  %v275_v62 = vsel %vm271_vm13, %v267_v57, 7  ;;  %v276_v63 = vsel %vm272_vm14, %v268_v58, 7 }
  0x3f   :  { %v277_v4 = vsel %vm273_vm15, %v269_v59, 7  ;;  %v278_v5 = vpack.c.b16 %v275_v62, %v274_v61  ;;  %v283_v6 = vshra.s32 %v629_v40, 18  ;;  %v284_v7 = vshra.s32 %v631_v41, 18 }
  0x40   :  { %261 = vst [vmem:[#allocation7 + $0x50] sm:$0xff] %v259_v60  ;;  %v279_v0 = vpack.c.b16 %v277_v4, %v276_v63  ;;  %v285_v1 = vshra.s32 %v636_v43, 18  ;;  %v286_v2 = vshra.s32 %v638_v48, 18  ;;  %vm291_vm0 = vcmp.ge.s32.totalorder %v581_v12, 9 }
  0x41   :  { %v287_v3 = vand.u32 7, %v283_v6  ;;  %v288_v8 = vand.u32 7, %v284_v7  ;;  %vm292_vm1 = vcmp.ge.s32.totalorder %v583_v13, 9  ;;  %vm293_vm2 = vcmp.ge.s32.totalorder %v585_v14, 9 }
  0x42   :  { %v280_v9 = vpack.c.b8 %v279_v0, %v278_v5  ;;  %v289_v10 = vand.u32 7, %v285_v1  ;;  %v290_v11 = vand.u32 7, %v286_v2  ;;  %vm294_vm3 = vcmp.ge.s32.totalorder %v587_v16, 9 }
  0x43   :  { %v295_v15 = vsel %vm291_vm0, %v287_v3, 7  ;;  %v296_v17 = vsel %vm292_vm1, %v288_v8, 7  ;;  %v304_v18 = vshra.s32 %v629_v40, 15  ;;  %v305_v19 = vshra.s32 %v631_v41, 15 }
  0x44   :  { %282 = vst [vmem:[#allocation7 + $0x58] sm:$0xff] %v280_v9  ;;  %v297_v20 = vsel %vm293_vm2, %v289_v10, 7  ;;  %v298_v21 = vsel %vm294_vm3, %v290_v11, 7  ;;  %v299_v22 = vpack.c.b16 %v296_v17, %v295_v15  ;;  %v306_v23 = vshra.s32 %v636_v43, 15 }
  0x45   :  { %v300_v24 = vpack.c.b16 %v298_v21, %v297_v20  ;;  %v307_v25 = vshra.s32 %v638_v48, 15  ;;  %v308_v26 = vand.u32 7, %v304_v18  ;;  %v309_v27 = vand.u32 7, %v305_v19 }
  0x46   :  { %v310_v28 = vand.u32 7, %v306_v23  ;;  %vm312_vm4 = vcmp.ge.s32.totalorder %v581_v12, 10  ;;  %vm313_vm5 = vcmp.ge.s32.totalorder %v583_v13, 10  ;;  %vm314_vm6 = vcmp.ge.s32.totalorder %v585_v14, 10 }
  0x47   :  { %v301_v29 = vpack.c.b8 %v300_v24, %v299_v22  ;;  %v311_v30 = vand.u32 7, %v307_v25  ;;  %vm315_vm7 = vcmp.ge.s32.totalorder %v587_v16, 10  ;;  %v316_v31 = vsel %vm312_vm4, %v308_v26, 7 }
  0x48   :  { %v317_v32 = vsel %vm313_vm5, %v309_v27, 7  ;;  %v318_v33 = vsel %vm314_vm6, %v310_v28, 7  ;;  %v325_v34 = vshra.s32 %v629_v40, 12  ;;  %v326_v35 = vshra.s32 %v631_v41, 12 }
  0x49   :  { %303 = vst [vmem:[#allocation7 + $0x60] sm:$0xff] %v301_v29  ;;  %v319_v36 = vsel %vm315_vm7, %v311_v30, 7  ;;  %v320_v37 = vpack.c.b16 %v317_v32, %v316_v31  ;;  %v327_v38 = vshra.s32 %v636_v43, 12  ;;  %v328_v39 = vshra.s32 %v638_v48, 12 }
  0x4a   :  { %v321_v42 = vpack.c.b16 %v319_v36, %v318_v33  ;;  %v329_v44 = vand.u32 7, %v325_v34  ;;  %v330_v45 = vand.u32 7, %v326_v35  ;;  %vm333_vm8 = vcmp.ge.s32.totalorder %v581_v12, 11 }
  0x4b   :  { %v331_v46 = vand.u32 7, %v327_v38  ;;  %v332_v47 = vand.u32 7, %v328_v39  ;;  %vm334_vm9 = vcmp.ge.s32.totalorder %v583_v13, 11  ;;  %vm335_vm10 = vcmp.ge.s32.totalorder %v585_v14, 11 }
  0x4c   :  { %v322_v49 = vpack.c.b8 %v321_v42, %v320_v37  ;;  %vm336_vm11 = vcmp.ge.s32.totalorder %v587_v16, 11  ;;  %v337_v50 = vsel %vm333_vm8, %v329_v44, 7  ;;  %v338_v51 = vsel %vm334_vm9, %v330_v45, 7 }
  0x4d   :  { %v339_v52 = vsel %vm335_vm10, %v331_v46, 7  ;;  %v340_v53 = vsel %vm336_vm11, %v332_v47, 7  ;;  %v341_v54 = vpack.c.b16 %v338_v51, %v337_v50  ;;  %v346_v55 = vshra.s32 %v629_v40, 9 }
  0x4e   :  { %324 = vst [vmem:[#allocation7 + $0x68] sm:$0xff] %v322_v49  ;;  %v342_v56 = vpack.c.b16 %v340_v53, %v339_v52  ;;  %v347_v57 = vshra.s32 %v631_v41, 9  ;;  %v348_v58 = vshra.s32 %v636_v43, 9  ;;  %v349_v59 = vshra.s32 %v638_v48, 9 }
  0x4f   :  { %v350_v60 = vand.u32 7, %v346_v55  ;;  %vm354_vm12 = vcmp.ge.s32.totalorder %v581_v12, 12  ;;  %vm355_vm13 = vcmp.ge.s32.totalorder %v583_v13, 12  ;;  %vm356_vm14 = vcmp.ge.s32.totalorder %v585_v14, 12 }
  0x50   :  { %v343_v61 = vpack.c.b8 %v342_v56, %v341_v54  ;;  %v351_v62 = vand.u32 7, %v347_v57  ;;  %v352_v63 = vand.u32 7, %v348_v58  ;;  %v353_v4 = vand.u32 7, %v349_v59 }
  0x51   :  { %vm357_vm15 = vcmp.ge.s32.totalorder %v587_v16, 12  ;;  %v358_v5 = vsel %vm354_vm12, %v350_v60, 7  ;;  %v367_v6 = vshra.s32 %v629_v40, 6  ;;  %v368_v7 = vshra.s32 %v631_v41, 6 }
  0x52   :  { %345 = vst [vmem:[#allocation7 + $0x70] sm:$0xff] %v343_v61  ;;  %v359_v0 = vsel %vm355_vm13, %v351_v62, 7  ;;  %v360_v1 = vsel %vm356_vm14, %v352_v63, 7  ;;  %v361_v2 = vsel %vm357_vm15, %v353_v4, 7  ;;  %v369_v3 = vshra.s32 %v636_v43, 6 }
  0x53   :  { %v362_v8 = vpack.c.b16 %v359_v0, %v358_v5  ;;  %v363_v9 = vpack.c.b16 %v361_v2, %v360_v1  ;;  %v370_v10 = vshra.s32 %v638_v48, 6  ;;  %v371_v11 = vand.u32 7, %v367_v6 }
  0x54   :  { %v372_v15 = vand.u32 7, %v368_v7  ;;  %v373_v17 = vand.u32 7, %v369_v3  ;;  %vm375_vm0 = vcmp.ge.s32.totalorder %v581_v12, 13  ;;  %vm376_vm1 = vcmp.ge.s32.totalorder %v583_v13, 13 }
  0x55   :  { %v364_v18 = vpack.c.b8 %v363_v9, %v362_v8  ;;  %v374_v19 = vand.u32 7, %v370_v10  ;;  %vm377_vm2 = vcmp.ge.s32.totalorder %v585_v14, 13  ;;  %vm378_vm3 = vcmp.ge.s32.totalorder %v587_v16, 13 }
  0x56   :  { %v379_v20 = vsel %vm375_vm0, %v371_v11, 7  ;;  %v380_v21 = vsel %vm376_vm1, %v372_v15, 7  ;;  %v381_v22 = vsel %vm377_vm2, %v373_v17, 7  ;;  %v388_v23 = vshra.s32 %v629_v40, 3 }
  0x57   :  { %366 = vst [vmem:[#allocation7 + $0x78] sm:$0xff] %v364_v18  ;;  %v382_v24 = vsel %vm378_vm3, %v374_v19, 7  ;;  %v383_v25 = vpack.c.b16 %v380_v21, %v379_v20  ;;  %v389_v26 = vshra.s32 %v631_v41, 3  ;;  %v390_v27 = vshra.s32 %v636_v43, 3 }
  0x58   :  { %v384_v28 = vpack.c.b16 %v382_v24, %v381_v22  ;;  %v391_v29 = vshra.s32 %v638_v48, 3  ;;  %v392_v30 = vand.u32 7, %v388_v23  ;;  %vm396_vm4 = vcmp.ge.s32.totalorder %v581_v12, 14 }
  0x59   :  { %v393_v31 = vand.u32 7, %v389_v26  ;;  %v394_v32 = vand.u32 7, %v390_v27  ;;  %vm397_vm5 = vcmp.ge.s32.totalorder %v583_v13, 14  ;;  %vm398_vm6 = vcmp.ge.s32.totalorder %v585_v14, 14 }
  0x5a   :  { %v385_v33 = vpack.c.b8 %v384_v28, %v383_v25  ;;  %v395_v34 = vand.u32 7, %v391_v29  ;;  %vm399_vm7 = vcmp.ge.s32.totalorder %v587_v16, 14  ;;  %v400_v35 = vsel %vm396_vm4, %v392_v30, 7 }
  0x5b   :  { %v401_v36 = vsel %vm397_vm5, %v393_v31, 7  ;;  %v402_v37 = vsel %vm398_vm6, %v394_v32, 7  ;;  %v409_v38 = vand.u32 7, %v629_v40  ;;  %v410_v39 = vand.u32 7, %v631_v41 }
  0x5c   :  { %387 = vst [vmem:[#allocation7 + $0x80] sm:$0xff] %v385_v33  ;;  %v403_v42 = vsel %vm399_vm7, %v395_v34, 7  ;;  %v404_v44 = vpack.c.b16 %v401_v36, %v400_v35  ;;  %v411_v45 = vand.u32 7, %v636_v43  ;;  %v412_v46 = vand.u32 7, %v638_v48 }
  0x5d   :  { %v405_v47 = vpack.c.b16 %v403_v42, %v402_v37  ;;  %vm413_vm8 = vcmp.ge.s32.totalorder %v581_v12, 15  ;;  %vm414_vm9 = vcmp.ge.s32.totalorder %v583_v13, 15  ;;  %vm415_vm10 = vcmp.ge.s32.totalorder %v585_v14, 15 }
  0x5e   :  { %vm416_vm11 = vcmp.ge.s32.totalorder %v587_v16, 15  ;;  %v417_v49 = vsel %vm413_vm8, %v409_v38, 7  ;;  %v418_v40 = vsel %vm414_vm9, %v410_v39, 7  ;;  %v419_v50 = vsel %vm415_vm10, %v411_v45, 7 }
  0x5f   :  { %v406_v41 = vpack.c.b8 %v405_v47, %v404_v44  ;;  %v420_v51 = vsel %vm416_vm11, %v412_v46, 7  ;;  %v421_v52 = vpack.c.b16 %v418_v40, %v417_v49 }
  0x60   :  { %v422_v43 = vpack.c.b16 %v420_v51, %v419_v50 }
  0x61   :  { %408 = vst [vmem:[#allocation7 + $0x88] sm:$0xff] %v406_v41 }
  0x62   :  { %v423_v12 = vpack.c.b8 %v422_v43, %v421_v52 }
  0x64   :  { %425 = vst [vmem:[#allocation7 + $0x90] sm:$0xff] %v423_v12 }
  0x65   :  { %438 = dma.vmem_to_hbm [thread:$0]  %s431_s1, 2432, %s433_s23, [#allocation4], %s534_s17, %s534_s17, %s535_s18  }
  0x66   :  { %531 = dma.done.wait [#allocation4], 2432  }
  0x67   :  { %532 = vsyncadd [#allocation4], 4294964864 }
  0x68   :  { %443 = vsyncpa [#allocation3], 1 }
  0x69   :  { %444 = vsyncpa [#allocation6], 1 }
  0x6a   :  { %445 = vsyncpa [#allocation4], 1 }

</bundles_post_ra>
